<compile_context>
chip_gen: v7x
topology: tpu7x:2x2x1
jax: 0.10.0
libtpu: 0.0.40
codegen_flags: <defaults>
</compile_context>

<pallas_src>
import functools
import math

import jax
import jax.numpy as jnp
from jax.experimental import pallas as pl
from jax.experimental.pallas import tpu as pltpu


_TARGET_TILE_BYTES = 2 * 1024 * 1024   # ~0.5-2 MiB tiles already hit ~85% of HBM roofline
_MAX_TILE_ROWS = 4096


# ----------------------------------------------------------------------------
# Hardware-aware sizing helpers.
# ----------------------------------------------------------------------------
def _vmem_capacity_bytes():
    try:
        return int(pltpu.get_tpu_info().vmem_capacity_bytes)
    except Exception:
        return 64 * 1024 * 1024   # conservative fallback (v7x per-core physical VMEM)


def _sublane_multiple(dtype):
    # Native sublane packing: 8 for 4-byte, 16 for 2-byte, 32 for 1-byte dtypes.
    return max(8, 32 // jnp.dtype(dtype).itemsize)


def _choose_tile_n(n, c, dtype):
    itemsize = jnp.dtype(dtype).itemsize
    sub = _sublane_multiple(dtype)
    rows = _TARGET_TILE_BYTES // max(1, c * itemsize)
    rows = max(sub, min(int(rows), _MAX_TILE_ROWS))
    rows = max(sub, (rows // sub) * sub)
    if rows >= n:
        return n
    return rows


def _tiled_vmem_limit(live_bytes, cap):
    # live pipeline buffers + headroom, floored at the common default and
    # capped well under physical VMEM so the surrounding program keeps room.
    limit = max(live_bytes + (8 << 20), 16 << 20)
    return int(min(limit, int(cap * 0.7)))


# ----------------------------------------------------------------------------
# Resident single-pass variant (small inputs): x read from HBM exactly once.
# ----------------------------------------------------------------------------
def _se_resident_kernel(x_ref, w1_ref, w2_ref, o_ref, *, inv_n):
    x = x_ref[...]

    # squeeze: per-channel mean over rows (f32 accumulation)
    y = jnp.sum(x.astype(jnp.float32), axis=0, keepdims=True) * inv_n       # (1, C)

    # excitation: Linear -> ReLU -> Linear -> Sigmoid (bias-free), runs once
    h = jnp.maximum(
        jnp.dot(y, w1_ref[...].astype(jnp.float32),
                preferred_element_type=jnp.float32), 0.0)                   # (1, H)
    g = jax.nn.sigmoid(
        jnp.dot(h, w2_ref[...].astype(jnp.float32),
                preferred_element_type=jnp.float32))                        # (1, C)

    # scale: broadcast gate over rows; keep the hot multiply in x's dtype
    o_ref[...] = (x * g.astype(x.dtype)).astype(o_ref.dtype)


def _se_block_resident(x, w1_t, w2_t, *, vmem_limit_bytes):
    N, C = x.shape
    H = w1_t.shape[1]
    itemsize = jnp.dtype(x.dtype).itemsize
    kernel = functools.partial(_se_resident_kernel, inv_n=1.0 / N)
    return pl.pallas_call(
        kernel,
        out_shape=jax.ShapeDtypeStruct((N, C), x.dtype),
        in_specs=[
            pl.BlockSpec(memory_space=pltpu.VMEM),
            pl.BlockSpec(memory_space=pltpu.VMEM),
            pl.BlockSpec(memory_space=pltpu.VMEM),
        ],
        out_specs=pl.BlockSpec(memory_space=pltpu.VMEM),
        compiler_params=pltpu.CompilerParams(
            vmem_limit_bytes=int(vmem_limit_bytes)),
        cost_estimate=pl.CostEstimate(
            flops=int(2 * N * C + 4 * C * H),
            transcendentals=int(C),
            bytes_accessed=int(2 * N * C * itemsize + 2 * C * H * 4),
        ),
    )(x, w1_t, w2_t)


# ----------------------------------------------------------------------------
# Tiled two-pass variant (large inputs).
# ----------------------------------------------------------------------------
def _se_colsum_kernel(x_ref, part_ref, *, n_rows, tile_n, tiles_per_part, num_tiles):
    """Per-partition per-column f32 sums; tail masking only on the last tile."""
    p = pl.program_id(0)
    t = pl.program_id(1)

    @pl.when(t == 0)
    def _():
        part_ref[...] = jnp.zeros_like(part_ref)

    x = x_ref[...]

    def _accumulate(vals):
        part_ref[...] += jnp.sum(vals.astype(jnp.float32), axis=0, keepdims=True)[None]

    if n_rows % tile_n != 0:
        g = p * tiles_per_part + t            # global tile index
        is_last = g == (num_tiles - 1)

        @pl.when(jnp.logical_not(is_last))
        def _():
            _accumulate(x)                     # steady state: no iota/select cost

        @pl.when(is_last)
        def _():
            rows = jax.lax.broadcasted_iota(jnp.int32, x.shape, 0) + g * tile_n
            _accumulate(jnp.where(rows < n_rows, x.astype(jnp.float32), 0.0))
    else:
        _accumulate(x)


def _se_scale_kernel(x_ref, gate_ref, o_ref):
    x = x_ref[...]
    o_ref[...] = (x * gate_ref[...].astype(x.dtype)).astype(o_ref.dtype)


def _se_block_tiled(x, w1_t, w2_t, tile_n):
    N, C = x.shape
    dtype = x.dtype
    itemsize = jnp.dtype(dtype).itemsize
    cap = _vmem_capacity_bytes()
    sub = _sublane_multiple(dtype)

    # Lane-dense fold for narrow channels: (N, C) -> (N/f, f*C), a free
    # row-major reshape, so pass-2 stores are full 128-lane vst's.
    fold = 1
    if C < 128:
        f = 128 // math.gcd(C, 128)
        if f > 1 and N % f == 0 and (N // f) >= sub:
            fold = f
    Nf, Cf = N // fold, C * fold
    xf = x.reshape(Nf, Cf) if fold > 1 else x

    if tile_n is None:
        tile_n = _choose_tile_n(Nf, Cf, dtype)
    else:
        tile_n = min(int(tile_n), Nf)
        if tile_n < Nf:
            tile_n = max(sub, (tile_n // sub) * sub)   # dtype-native sublane packing

    num_tiles = pl.cdiv(Nf, tile_n)
    tile_bytes = tile_n * Cf * itemsize

    # Split the reduction into partitions (sharded across both TCs on v7x via
    # the "parallel" leading axis) when the tile count divides evenly.
    num_parts = 2 if (num_tiles >= 4 and num_tiles % 2 == 0) else 1
    tiles_per_part = num_tiles // num_parts

    # ---- pass 1: streaming per-column partial sums (HBM-bound) ----
    reduce_kernel = functools.partial(
        _se_colsum_kernel, n_rows=Nf, tile_n=tile_n,
        tiles_per_part=tiles_per_part, num_tiles=num_tiles)
    partials = pl.pallas_call(
        reduce_kernel,
        out_shape=jax.ShapeDtypeStruct((num_parts, 1, Cf), jnp.float32),
        grid_spec=pltpu.PrefetchScalarGridSpec(
            num_scalar_prefetch=0,
            grid=(num_parts, tiles_per_part),
            in_specs=[pl.BlockSpec(
                (tile_n, Cf), lambda p, t: (p * tiles_per_part + t, 0))],
            out_specs=pl.BlockSpec((1, 1, Cf), lambda p, t: (p, 0, 0)),
        ),
        compiler_params=pltpu.CompilerParams(
            dimension_semantics=("parallel", "arbitrary"),
            vmem_limit_bytes=_tiled_vmem_limit(2 * tile_bytes, cap)),
        cost_estimate=pl.CostEstimate(
            flops=int(Nf * Cf),
            transcendentals=0,
            bytes_accessed=int(Nf * Cf * itemsize + num_parts * Cf * 4),
        ),
    )(xf)

    # Tiny excitation MLP hoisted out of Pallas (runs once, MXU-idle work).
    sums = jnp.sum(partials, axis=0)                                    # (1, Cf)
    if fold > 1:
        sums = jnp.sum(sums.reshape(fold, C), axis=0, keepdims=True)   # (1, C)
    y = sums * (1.0 / N)
    h = jnp.maximum(y @ w1_t.astype(jnp.float32), 0.0)                  # (1, H)
    gate = jax.nn.sigmoid(h @ w2_t.astype(jnp.float32))                 # (1, C) f32
    if fold > 1:
        gate = jnp.tile(gate, (1, fold))                                # (1, Cf)

    # ---- pass 2: stream row tiles and apply the gate ----
    out = pl.pallas_call(
        _se_scale_kernel,
        out_shape=jax.ShapeDtypeStruct((Nf, Cf), dtype),
        grid_spec=pltpu.PrefetchScalarGridSpec(
            num_scalar_prefetch=0,
            grid=(num_tiles,),
            in_specs=[
                pl.BlockSpec((tile_n, Cf), lambda i: (i, 0)),
                pl.BlockSpec((1, Cf), lambda i: (0, 0)),
            ],
            out_specs=pl.BlockSpec((tile_n, Cf), lambda i: (i, 0)),
        ),
        compiler_params=pltpu.CompilerParams(
            dimension_semantics=("parallel",),
            vmem_limit_bytes=_tiled_vmem_limit(4 * tile_bytes, cap)),
        cost_estimate=pl.CostEstimate(
            flops=int(Nf * Cf),
            transcendentals=0,
            bytes_accessed=int(2 * Nf * Cf * itemsize + Cf * 4),
        ),
    )(xf, gate)
    return out.reshape(N, C) if fold > 1 else out


# ----------------------------------------------------------------------------
# Wrapper: dispatch between resident and tiled paths.
# ----------------------------------------------------------------------------
def se_block(x, w1_t, w2_t, *, tile_n=None):
    """x: (N, C); w1_t: (C, H) = fc[0].weight.T; w2_t: (H, C) = fc[2].weight.T."""
    N, C = x.shape
    itemsize = jnp.dtype(x.dtype).itemsize

    if tile_n is None:
        cap = _vmem_capacity_bytes()
        budget = int(cap * 0.65)          # ~83 MiB @ 128 MiB VMEM, ~41 MiB on v7x
        # x + out in x.dtype, plus a full f32 temp of x when x is narrower than f32,
        # plus weights and a little slack.
        extra_f32 = 4 if itemsize < 4 else 0
        need = (N * C * (2 * itemsize + extra_f32)
                + 2 * C * w1_t.shape[1] * 4 + (1 << 20))
        if need <= budget:
            return _se_block_resident(
                x, w1_t, w2_t,
                vmem_limit_bytes=min(budget, need + (4 << 20)))
        # fall through to the tiled two-pass path

    return _se_block_tiled(x, w1_t, w2_t, tile_n)


def se_block_ref(x, w1_t, w2_t):
    y = jnp.mean(x.astype(jnp.float32), axis=0, keepdims=True)
    h = jnp.maximum(y @ w1_t.astype(jnp.float32), 0.0)
    g = jax.nn.sigmoid(h @ w2_t.astype(jnp.float32))
    return x * g.astype(x.dtype)


if __name__ == "__main__":
    key = jax.random.PRNGKey(0)
    kx1, kx2, kx3, kw1, kw2 = jax.random.split(key, 5)

    C, reduction = 128, 16
    H = C // reduction

    # Deterministic PyTorch-Linear-like init (kaiming-uniform bounds), no bias.
    b1 = 1.0 / (C ** 0.5)
    b2 = 1.0 / (H ** 0.5)
    w1 = jax.random.uniform(kw1, (H, C), minval=-b1, maxval=b1, dtype=jnp.float32)  # fc[0].weight
    w2 = jax.random.uniform(kw2, (C, H), minval=-b2, maxval=b2, dtype=jnp.float32)  # fc[2].weight
    w1_t, w2_t = w1.T, w2.T  # pre-transpose: kernel does plain row-major matmuls

    # 1) Small input -> resident single-pass path.
    x_small = jax.random.normal(kx1, (8, C), dtype=jnp.float32)
    out_small = jax.block_until_ready(se_block(x_small, w1_t, w2_t))
    ref_small = se_block_ref(x_small, w1_t, w2_t)
    assert out_small.shape == x_small.shape
    assert jnp.allclose(out_small, ref_small, atol=1e-5, rtol=1e-5)

    # 2) Larger ragged input (1000 % 256 != 0) -> tiled two-pass path
    #    (4 tiles -> 2 partitions, masked last tile).
    x_big = jax.random.normal(kx2, (1000, C), dtype=jnp.float32)
    out_big = jax.block_until_ready(se_block(x_big, w1_t, w2_t, tile_n=256))
    ref_big = se_block_ref(x_big, w1_t, w2_t)
    assert out_big.shape == x_big.shape
    assert jnp.allclose(out_big, ref_big, atol=1e-5, rtol=1e-5)

    # 3) Narrow channels (C=64 < 128) -> tiled path with lane-dense fold.
    C2, H2 = 64, 64 // reduction
    b1n = 1.0 / (C2 ** 0.5)
    b2n = 1.0 / (H2 ** 0.5)
    w1n = jax.random.uniform(kw1, (H2, C2), minval=-b1n, maxval=b1n, dtype=jnp.float32)
    w2n = jax.random.uniform(kw2, (C2, H2), minval=-b2n, maxval=b2n, dtype=jnp.float32)
    x_narrow = jax.random.normal(kx3, (1000, C2), dtype=jnp.float32)
    out_narrow = jax.block_until_ready(se_block(x_narrow, w1n.T, w2n.T, tile_n=128))
    ref_narrow = se_block_ref(x_narrow, w1n.T, w2n.T)
    assert out_narrow.shape == x_narrow.shape
    assert jnp.allclose(out_narrow, ref_narrow, atol=1e-5, rtol=1e-5)

    print("KERNEL_OK")
</pallas_src>

<mosaic_0001>
module attributes {stable_mosaic.version = 11 : i64} {
  func.func @_se_resident_kernel(%arg0: memref<8x128xf32, #tpu.memory_space<vmem>>, %arg1: memref<128x8xf32, #tpu.memory_space<vmem>>, %arg2: memref<8x128xf32, #tpu.memory_space<vmem>>, %arg3: memref<8x128xf32, #tpu.memory_space<vmem>>) attributes {dimension_semantics = [], scalar_prefetch = 0 : i64, scratch_operands = 0 : i64, tpu.core_type = #tpu.core_type<tc>} {
    %c0 = arith.constant 0 : index
    %c0_0 = arith.constant 0 : index
    %0 = vector.load %arg0[%c0, %c0_0] : memref<8x128xf32, #tpu.memory_space<vmem>>, vector<8x128xf32>
    %cst = arith.constant dense<0.000000e+00> : vector<128xf32>
    %1 = vector.multi_reduction <add>, %0, %cst [0] : vector<8x128xf32> to vector<128xf32>
    %2 = vector.shape_cast %1 : vector<128xf32> to vector<1x128xf32>
    %cst_1 = arith.constant 1.250000e-01 : f32
    %3 = vector.broadcast %cst_1 : f32 to vector<1x128xf32>
    %4 = arith.mulf %2, %3 : vector<1x128xf32>
    %c0_2 = arith.constant 0 : index
    %c0_3 = arith.constant 0 : index
    %5 = vector.load %arg1[%c0_2, %c0_3] : memref<128x8xf32, #tpu.memory_space<vmem>>, vector<128x8xf32>
    %cst_4 = arith.constant dense<0.000000e+00> : vector<1x8xf32>
    %6 = tpu.matmul %4, %5, %cst_4 {dimension_numbers = #tpu.dot_dimension_numbers<[1], [0], [0], [1], [0, 0, 1, 1], [], []>} : vector<1x128xf32>, vector<128x8xf32>, vector<1x8xf32> -> vector<1x8xf32>
    %cst_5 = arith.constant 0.000000e+00 : f32
    %7 = vector.broadcast %cst_5 : f32 to vector<1x8xf32>
    %8 = arith.maximumf %6, %7 : vector<1x8xf32>
    %c0_6 = arith.constant 0 : index
    %c0_7 = arith.constant 0 : index
    %9 = vector.load %arg2[%c0_6, %c0_7] : memref<8x128xf32, #tpu.memory_space<vmem>>, vector<8x128xf32>
    %cst_8 = arith.constant dense<0.000000e+00> : vector<1x128xf32>
    %10 = tpu.matmul %8, %9, %cst_8 {dimension_numbers = #tpu.dot_dimension_numbers<[1], [0], [0], [1], [0, 0, 1, 1], [], []>} : vector<1x8xf32>, vector<8x128xf32>, vector<1x128xf32> -> vector<1x128xf32>
    %11 = arith.negf %10 : vector<1x128xf32>
    %12 = math.exp %11 : vector<1x128xf32>
    %cst_9 = arith.constant 1.000000e+00 : f32
    %13 = vector.broadcast %cst_9 : f32 to vector<1x128xf32>
    %14 = arith.addf %13, %12 : vector<1x128xf32>
    %15 = arith.divf %13, %14 : vector<1x128xf32>
    %16 = vector.broadcast %15 : vector<1x128xf32> to vector<8x128xf32>
    %17 = arith.mulf %0, %16 : vector<8x128xf32>
    %c0_10 = arith.constant 0 : index
    %c0_11 = arith.constant 0 : index
    %18 = vector.load %arg3[%c0_10, %c0_11] : memref<8x128xf32, #tpu.memory_space<vmem>>, vector<8x128xf32>
    tpu.vector_store %arg3[%c0_10, %c0_11], %17 {strides = array<i32>} : memref<8x128xf32, #tpu.memory_space<vmem>>, vector<8x128xf32>,
    return
  }
}

</mosaic_0001>

<bundles_post_ra>
// kernel: tpu_custom_call.1
= control target key start
LH: loop header
LB: loop body
LE: loop exit
PB: predicated region body
PF: predicated region fallthrough
CT: control target
= control target key end

     0   :  { %v328_v3 = vmov 0.0|0.0   ;;  %vm329_vm0 = vmmov 0   ;;  %v330_v6 = vmov 0.0   ;;  %s418_s0 = inlined_call_operand.vmem [shape: f32[8,128], index: 0, kind: input, shape index: {}]   ;;  %s419_s1 = inlined_call_operand.vmem [shape: f32[128,8], index: 1, kind: input, shape index: {}]   ;;  %s420_s2 = inlined_call_operand.vmem [shape: f32[8,128], index: 2, kind: input, shape index: {}]   ;;  %s421_s3 = inlined_call_operand.hbm [shape: f32[8,128], index: 3, kind: output, shape index: {}]  }
   0x1   :  { %v23_v0 = vld [vmem:[%s419_s1] sm:$0xff]  ;;  %v24_v1 = vld [vmem:[%s419_s1 + $0x8] sm:$0xff]  ;;  %v25_v2 = vld [vmem:[%s419_s1 + $0x10] sm:$0xff]  ;;  %272 = vmatprep.subr.bf16.mxu0 %v328_v3  ;;  %264 = vmatprep.mubr.msk.f32.mxu0 %vm329_vm0, %v330_v6 }
   0x2   :  { %v273_v4 = vpack.c.bf16 %v24_v1, %v23_v0  ;;  %v26_v5 = vld [vmem:[%s419_s1 + $0x18] sm:$0xff]  ;;  %267 = vmatprep.subr.mxu1 %v330_v6  ;;  %269 = vmatprep.mubr.msk.f32.mxu1 %vm329_vm0, %v330_v6  ;;  %v27_v8 = vld [vmem:[%s419_s1 + $0x20] sm:$0xff]  ;;  %v28_v9 = vld [vmem:[%s419_s1 + $0x28] sm:$0xff] }
   0x3   :  { %v276_v7 = vpack.c.bf16 %v26_v5, %v25_v2  ;;  %v15_v10 = vld [vmem:[%s418_s0] sm:$0xff] }
   0x4   :  { %274 = vmatpush3.bf16.msra.mxu0 %v273_v4 }
   0x5   :  { %275 = vmatprep.subr.bf16.mxu0 %v328_v3 }
   0x6   :  { %8 = vsyncpa [#allocation3], 0  ;;  %v16_v11 = vrot.slane %v15_v10, 4  ;;  %v279_v12 = vpack.c.bf16 %v28_v9, %v27_v8  ;;  %v29_v13 = vld [vmem:[%s419_s1 + $0x30] sm:$0xff]  ;;  %v30_v14 = vld [vmem:[%s419_s1 + $0x38] sm:$0xff]  ;;  %vm111_vm1 = vcmask 64512   ;;  %v191_v43 = vlaneseq }
   0x7   :  { %v282_v16 = vpack.c.bf16 %v30_v14, %v29_v13  ;;  %v31_v17 = vld [vmem:[%s419_s1 + $0x40] sm:$0xff]  ;;  %v32_v18 = vld [vmem:[%s419_s1 + $0x48] sm:$0xff]  ;;  %v33_v21 = vld [vmem:[%s419_s1 + $0x50] sm:$0xff] }
   0x8   :  { %277 = vmatpush3.bf16.msra.mxu0 %v276_v7  ;;  %v17_v15 = vadd.f32 %v16_v11, %v15_v10  ;;  %v285_v20 = vpack.c.bf16 %v32_v18, %v31_v17  ;;  %v34_v22 = vld [vmem:[%s419_s1 + $0x58] sm:$0xff]  ;;  %v35_v25 = vld [vmem:[%s419_s1 + $0x60] sm:$0xff]  ;;  %v36_v26 = vld [vmem:[%s419_s1 + $0x68] sm:$0xff]  ;;  %v192_v44 = vshrl.u32 %v191_v43, 7 }
   0x9   :  { %278 = vmatprep.subr.bf16.mxu0 %v328_v3  ;;  %v288_v24 = vpack.c.bf16 %v34_v22, %v33_v21  ;;  %v291_v28 = vpack.c.bf16 %v36_v26, %v35_v25  ;;  %v37_v29 = vld [vmem:[%s419_s1 + $0x70] sm:$0xff]  ;;  %v38_v30 = vld [vmem:[%s419_s1 + $0x78] sm:$0xff]  ;;  %v110_v34 = vld [vmem:[%s420_s2] sm:$0xff]  ;;  %s331_s1 = smov [#allocation2]  }
   0xa   :  { %v18_v19 = vrot.slane %v17_v15, 2  ;;  %v294_v32 = vpack.c.bf16 %v38_v30, %v37_v29  ;;  %268 = vmatpush3.msra.mxu1 %v110_v34  ;;  %v193_v45 = vsub.s32 0, %v192_v44  ;;  %s203_s20 = sshll.u32 %s331_s1, 4  ;;  %s204_s20 = int_to_ptr.vmem [resolvable:$true] %s203_s20 }
   0xb   :  { %s304_s2 = scalar_lea.vmem %s204_s20, 128  ;;  %p309_p1 = scmp.lt.s32.totalorder %s204_s20, %s204_s20 }
   0xc   :  { %280 = vmatpush3.bf16.msra.mxu0 %v279_v12  ;;  %v19_v23 = vadd.f32 %v18_v19, %v17_v15  ;;  %p305_p0 = scmp.ne.s32.totalorder %s204_s20, %s304_s2  ;;  %p310_p2 = scmp.lt.s32.totalorder %s304_s2, %s304_s2 }
   0xd   :  { %281 = vmatprep.subr.bf16.mxu0 %v328_v3 }
   0xe   :  { %v20_v27 = vrot.slane %v19_v23, 1  ;;  %p311_p3 = por %p310_p2, %p309_p1 }
  0x10   :  { %283 = vmatpush3.bf16.msra.mxu0 %v282_v16  ;;  %v21_v31 = vadd.f32 %v20_v27, %v19_v23  ;;  %p312_p4 = pnand %p311_p3, %p305_p0 }
  0x11   :  { %284 = vmatprep.subr.bf16.mxu0 %v328_v3 }
  0x12   :  { %v22_v33 = vmul.f32 0.125, %v21_v31 }
  0x14   :  { %286 = vmatpush3.bf16.msra.mxu0 %v285_v20 }
  0x15   :  { %287 = vmatprep.subr.bf16.mxu0 %v328_v3 }
  0x18   :  { %289 = vmatpush3.bf16.msra.mxu0 %v288_v24 }
  0x19   :  { %290 = vmatprep.subr.bf16.mxu0 %v328_v3 }
  0x1c   :  { %292 = vmatpush3.bf16.msra.mxu0 %v291_v28 }
  0x1d   :  { %293 = vmatprep.subr.bf16.mxu0 %v328_v3 }
  0x20   :  { %295 = vmatpush3.bf16.msra.mxu0 %v294_v32 }
  0x23   :  { %265 = vmatmul.mubr.f32.vlgmr.msra.gmra.mrb[0].mxu0 %v22_v33 }
  0xf6   :  { %v105_v35 = vpop.f32.mrb[0].mxu0 }
  0xf7   :  { %v109_v36 = vmax.f32 %v105_v35, 0.0  ;;  %v266_v37 = vpop.f32.mrb[1].mxu0 }
  0xf9   :  { %270 = vmatmul.mubr.msk.f32.vlgmr.msra.gmra.mrb[0].mxu1 %vm111_vm1, %v109_v36 }
 0x1cc   :  { %v181_v38 = vpop.f32.mrb[0].mxu1 }
 0x1cd   :  { %v212_v39 = vmul.f32 -1.442695, %v181_v38  ;;  %v271_v40 = vpop.f32.mrb[1].mxu1 }
 0x1cf   :  { %300 = vpow2.f32 %v212_v39 }
 0x1d9   :  { %v301_v41 = vpop.eup %300 }
 0x1da   :  { %v188_v42 = vadd.f32 1.0, %v301_v41 }
 0x1dc   :  { %302 = vrcp.f32 %v188_v42 }
 0x1e6   :  { %v303_v46 = vpop.eup %302 }
 0x1e7   :  { %v194_v47 = vrot.slane %v303_v46, %v193_v45 }
 0x1e9   :  { %v195_v48 = vmul.f32 %v194_v47, %v15_v10 }
 0x1eb   :  { %196 = vst [vmem:[#allocation2] sm:$0xff] %v195_v48 }
 0x1ec   :  { %315 = shalt.err (!%p312_p4)
}
 0x1ed   :  { %s316_s23 = scalar_lea.hbm %s421_s3, 128 }
 0x1ee   :  { %p317_p5 = scmp.ne.s32.totalorder %s421_s3, %s316_s23  ;;  %p320_p6 = scmp.lt.u32.totalorder %s316_s23, %s421_s3 }
 0x1f0   :  { %p322_p7 = pnand %p320_p6, %p317_p5 }
 0x1f2   :  { %325 = shalt.err (!%p322_p7)
}
 0x1f3   :  { %206 = dma.vmem_to_hbm [thread:$0]  %s204_s20, 128, %s421_s3, [#allocation3]  }
 0x1f4   :  { %326 = dma.done.wait [#allocation3], 128  }
 0x1f5   :  { %327 = vsyncadd [#allocation3], 4294967168 }
 0x1f6   :  { %210 = vsyncpa [#allocation3], 1 }

</bundles_post_ra>
